<compile_context>
chip_gen: v5e
topology: v5e:2x2
jax: 0.10.0
libtpu: 0.0.40
codegen_flags: <defaults>
</compile_context>

<pallas_src>
import math
import jax
import jax.numpy as jnp
from jax import lax
from jax.experimental import pallas as pl
from jax.experimental.pallas import tpu as pltpu

N_INPUT = 82          # module-level n_input
N_HID = 45            # self.n
DIM_K = 4
DIM_V = 8
NUM_HEADS = 2
DK = DIM_K // NUM_HEADS   # 2
DV = DIM_V // NUM_HEADS   # 4
N_OUT = 2
SCALE = 1.0 / math.sqrt(DK)
_INV_SQRT2 = 1.0 / math.sqrt(2.0)


def _round_up(a, m):
    return ((a + m - 1) // m) * m


def _gelu_exact(x):
    # PyTorch F.gelu default = exact erf formulation
    return 0.5 * x * (1.0 + lax.erf(x * _INV_SQRT2))


def transformer_kernel(x_ref, w1_ref, b1_ref, wqkv_ref, w5_ref, b5_ref, out_ref):
    x = x_ref[...]                                                      # (TB, 82)

    # fc1 + exact GELU (+ dropout p=0.004 is identity at inference).
    # Biases are (1, N) rows added via implicit broadcast (no explicit broadcast op).
    h = jnp.dot(x, w1_ref[...], preferred_element_type=jnp.float32) + b1_ref[...]
    h = _gelu_exact(h)                                                  # (TB, 45)

    # Fused q|k|v projection: single MXU matmul, then static lane slices.
    qkv = jnp.dot(h, wqkv_ref[...], preferred_element_type=jnp.float32)  # (TB, 16)
    q = qkv[:, 0:DIM_K]                                                 # (TB, 4)
    k = qkv[:, DIM_K:2 * DIM_K]                                         # (TB, 4)
    v = qkv[:, 2 * DIM_K:2 * DIM_K + DIM_V]                             # (TB, 8)

    # Per-batch 2x2 score matrix: VPU element-wise products + lane-slice adds
    # (avoids four XLU cross-lane reductions).
    k_sw = jnp.concatenate([k[:, DK:2 * DK], k[:, 0:DK]], axis=-1)      # heads of k swapped
    p_same = q * k        # lanes: [q0k0, q1k1, q2k2, q3k3]
    p_cross = q * k_sw    # lanes: [q0k2, q1k3, q2k0, q3k1]
    d00 = (p_same[:, 0:1] + p_same[:, 1:2]) * SCALE                     # (TB, 1) each
    d11 = (p_same[:, 2:3] + p_same[:, 3:4]) * SCALE
    d01 = (p_cross[:, 0:1] + p_cross[:, 1:2]) * SCALE
    d10 = (p_cross[:, 2:3] + p_cross[:, 3:4]) * SCALE

    # Softmax over the 2 keys per head; denominators via EUP approx reciprocal.
    m0 = jnp.maximum(d00, d01)
    e00 = jnp.exp(d00 - m0)
    e01 = jnp.exp(d01 - m0)
    inv0 = pl.reciprocal(e00 + e01, approx=True)
    m1 = jnp.maximum(d10, d11)
    e10 = jnp.exp(d10 - m1)
    e11 = jnp.exp(d11 - m1)
    inv1 = pl.reciprocal(e10 + e11, approx=True)

    v0 = v[:, 0:DV]
    v1 = v[:, DV:2 * DV]
    att0 = (e00 * inv0) * v0 + (e01 * inv0) * v1                        # head 0, (TB, 4)
    att1 = (e10 * inv1) * v0 + (e11 * inv1) * v1                        # head 1, (TB, 4)

    # Fuse heads before GELU + fc5: one GELU on (TB, 8), one matmul.
    att = jnp.concatenate([att0, att1], axis=-1)                        # (TB, 8) head-major
    g = _gelu_exact(att)

    # fc5 (w5 rows already permuted in the wrapper to match transpose(1,2).reshape order)
    logits = jnp.dot(g, w5_ref[...], preferred_element_type=jnp.float32) + b5_ref[...]

    # Final 2-class softmax (exact divide for output precision), lane-slice form.
    l0 = logits[:, 0:1]
    l1 = logits[:, 1:2]
    mm = jnp.maximum(l0, l1)
    e0 = jnp.exp(l0 - mm)
    e1 = jnp.exp(l1 - mm)
    inv = 1.0 / (e0 + e1)
    out_ref[...] = jnp.concatenate([e0 * inv, e1 * inv], axis=-1)       # (TB, 2)


def transformer_forward(x, params, tb=512):
    """x: (B, 82) f32. params = (w1, b1, wqkv, w5_perm, b5)."""
    w1, b1, wqkv, w5_perm, b5 = params
    B = x.shape[0]

    # Batch tile: multiple of 8 (sublane), capped at 512; pad B up to a multiple of it.
    tb = min(int(tb), _round_up(B, 8))
    tb = _round_up(tb, 8)
    Bp = _round_up(B, tb)
    if Bp != B:
        x = jnp.pad(x, ((0, Bp - B), (0, 0)))   # zero rows -> finite garbage, sliced off below

    def wspec(shape):
        nd = len(shape)
        return pl.BlockSpec(shape, lambda i, _nd=nd: (0,) * _nd)   # resident weights

    out = pl.pallas_call(
        transformer_kernel,
        out_shape=jax.ShapeDtypeStruct((Bp, N_OUT), jnp.float32),
        grid=(Bp // tb,),
        in_specs=[pl.BlockSpec((tb, N_INPUT), lambda i: (i, 0)),
                  wspec(w1.shape), wspec(b1.shape), wspec(wqkv.shape),
                  wspec(w5_perm.shape), wspec(b5.shape)],
        out_specs=pl.BlockSpec((tb, N_OUT), lambda i: (i, 0)),
        compiler_params=pltpu.CompilerParams(dimension_semantics=("parallel",)),
    )(x, w1, b1, wqkv, w5_perm, b5)
    return out[:B]


def reference(x, w1, b1, wq, wk, wv, w5_t, b5):
    # Pure-JAX mirror of the PyTorch forward (eval mode), for validation.
    B = x.shape[0]
    h = jax.nn.gelu(x @ w1 + b1[0], approximate=False)
    q = (h @ wq).reshape(B, NUM_HEADS, DK)
    k = (h @ wk).reshape(B, NUM_HEADS, DK)
    v = (h @ wv).reshape(B, NUM_HEADS, DV)
    dist = jnp.einsum('bij,bkj->bik', q, k) * SCALE
    dist = jax.nn.softmax(dist, axis=-1)
    att = jnp.einsum('bij,bjd->bid', dist, v)
    att = jnp.transpose(att, (0, 2, 1)).reshape(B, DIM_V)
    g = jax.nn.gelu(att, approximate=False)
    logits = g @ w5_t + b5[0]
    return jax.nn.softmax(logits, axis=-1)   # F.softmax on 2-D defaults to dim=1


if __name__ == "__main__":
    key = jax.random.PRNGKey(0)
    keys = jax.random.split(key, 8)

    def uinit(k, shape, fan_in):
        bound = 1.0 / math.sqrt(fan_in)
        return jax.random.uniform(k, shape, jnp.float32, -bound, bound)

    # Deterministic synthetic parameters (PyTorch Linear-style uniform init).
    w1 = uinit(keys[1], (N_INPUT, N_HID), N_INPUT)
    b1 = uinit(keys[2], (1, N_HID), N_INPUT)
    wq = uinit(keys[3], (N_HID, DIM_K), N_HID)
    wk = uinit(keys[4], (N_HID, DIM_K), N_HID)
    wv = uinit(keys[5], (N_HID, DIM_V), N_HID)
    w5_t = uinit(keys[6], (DIM_V, N_OUT), DIM_V)
    b5 = uinit(keys[7], (1, N_OUT), DIM_V)

    # Fused q|k|v weight for the single projection matmul.
    wqkv = jnp.concatenate([wq, wk, wv], axis=1)                  # (45, 16)

    # Fold PyTorch's att.transpose(1,2).reshape column order into fc5's weight rows:
    # torch column index c = d*num_heads + h  <->  kernel column index h*DV + d.
    perm = jnp.array([d * NUM_HEADS + h for h in range(NUM_HEADS) for d in range(DV)],
                     dtype=jnp.int32)
    w5_perm = w5_t[perm, :]

    params = (w1, b1, wqkv, w5_perm, b5)

    # --- case 1: small batch, single tile ---
    B = 8
    x = jax.random.normal(keys[0], (B, N_INPUT), dtype=jnp.float32)
    out = jax.block_until_ready(transformer_forward(x, params))
    ref = reference(x, w1, b1, wq, wk, wv, w5_t, b5)
    assert out.shape == (B, N_OUT)
    # tolerance loosened slightly vs 1e-5 because the attention softmax uses approx reciprocal
    assert jnp.allclose(out, ref, atol=1e-4, rtol=1e-4), "mismatch vs reference (B=8)"
    assert jnp.allclose(jnp.sum(out, axis=-1), 1.0, atol=1e-5), "rows not normalized"

    # --- case 2: ragged batch, multi-step pipelined grid (pads 20 -> 24, 3 tiles of 8) ---
    B2 = 20
    x2 = jax.random.normal(jax.random.PRNGKey(1), (B2, N_INPUT), dtype=jnp.float32)
    out2 = jax.block_until_ready(transformer_forward(x2, params, tb=8))
    ref2 = reference(x2, w1, b1, wq, wk, wv, w5_t, b5)
    assert out2.shape == (B2, N_OUT)
    assert jnp.allclose(out2, ref2, atol=1e-4, rtol=1e-4), "mismatch vs reference (B=20, tb=8)"

    print("KERNEL_OK")
</pallas_src>

<mosaic_0001>
module attributes {stable_mosaic.version = 11 : i64} {
  func.func @transformer_kernel(%arg0: i32, %arg1: memref<8x82xf32, #tpu.memory_space<vmem>>, %arg2: memref<82x45xf32, #tpu.memory_space<vmem>>, %arg3: memref<1x45xf32, #tpu.memory_space<vmem>>, %arg4: memref<45x16xf32, #tpu.memory_space<vmem>>, %arg5: memref<8x2xf32, #tpu.memory_space<vmem>>, %arg6: memref<1x2xf32, #tpu.memory_space<vmem>>, %arg7: memref<8x2xf32, #tpu.memory_space<vmem>>) attributes {dimension_semantics = [#tpu.dimension_semantics<parallel>], iteration_bounds = array<i64: 1>, scalar_prefetch = 0 : i64, scratch_operands = 0 : i64, tpu.core_type = #tpu.core_type<tc>, window_params = [{transform_indices = @transform_0, window_bounds = array<i64: 8, 82>}, {pipeline_mode = #tpu.pipeline_mode<synchronous>, transform_indices = @transform_1, window_bounds = array<i64: 82, 45>}, {pipeline_mode = #tpu.pipeline_mode<synchronous>, transform_indices = @transform_2, window_bounds = array<i64: 1, 45>}, {pipeline_mode = #tpu.pipeline_mode<synchronous>, transform_indices = @transform_3, window_bounds = array<i64: 45, 16>}, {pipeline_mode = #tpu.pipeline_mode<synchronous>, transform_indices = @transform_4, window_bounds = array<i64: 8, 2>}, {pipeline_mode = #tpu.pipeline_mode<synchronous>, transform_indices = @transform_5, window_bounds = array<i64: 1, 2>}, {transform_indices = @transform_6, window_bounds = array<i64: 8, 2>}]} {
    %c0 = arith.constant 0 : index
    %c0_0 = arith.constant 0 : index
    %0 = vector.load %arg1[%c0, %c0_0] : memref<8x82xf32, #tpu.memory_space<vmem>>, vector<8x82xf32>
    %c0_1 = arith.constant 0 : index
    %c0_2 = arith.constant 0 : index
    %1 = vector.load %arg2[%c0_1, %c0_2] : memref<82x45xf32, #tpu.memory_space<vmem>>, vector<82x45xf32>
    %cst = arith.constant dense<0.000000e+00> : vector<8x45xf32>
    %2 = tpu.matmul %0, %1, %cst {dimension_numbers = #tpu.dot_dimension_numbers<[1], [0], [0], [1], [0, 0, 1, 1], [], []>} : vector<8x82xf32>, vector<82x45xf32>, vector<8x45xf32> -> vector<8x45xf32>
    %c0_3 = arith.constant 0 : index
    %c0_4 = arith.constant 0 : index
    %3 = vector.load %arg3[%c0_3, %c0_4] : memref<1x45xf32, #tpu.memory_space<vmem>>, vector<1x45xf32>
    %4 = vector.broadcast %3 : vector<1x45xf32> to vector<8x45xf32>
    %5 = arith.addf %2, %4 : vector<8x45xf32>
    %cst_5 = arith.constant 5.000000e-01 : f32
    %6 = vector.broadcast %cst_5 : f32 to vector<8x45xf32>
    %7 = arith.mulf %6, %5 : vector<8x45xf32>
    %cst_6 = arith.constant 0.707106769 : f32
    %8 = vector.broadcast %cst_6 : f32 to vector<8x45xf32>
    %9 = arith.mulf %5, %8 : vector<8x45xf32>
    %10 = math.erf %9 : vector<8x45xf32>
    %cst_7 = arith.constant 1.000000e+00 : f32
    %11 = vector.broadcast %cst_7 : f32 to vector<8x45xf32>
    %12 = arith.addf %11, %10 : vector<8x45xf32>
    %13 = arith.mulf %7, %12 : vector<8x45xf32>
    %c0_8 = arith.constant 0 : index
    %c0_9 = arith.constant 0 : index
    %14 = vector.load %arg4[%c0_8, %c0_9] : memref<45x16xf32, #tpu.memory_space<vmem>>, vector<45x16xf32>
    %cst_10 = arith.constant dense<0.000000e+00> : vector<8x16xf32>
    %15 = tpu.matmul %13, %14, %cst_10 {dimension_numbers = #tpu.dot_dimension_numbers<[1], [0], [0], [1], [0, 0, 1, 1], [], []>} : vector<8x45xf32>, vector<45x16xf32>, vector<8x16xf32> -> vector<8x16xf32>
    %16 = vector.extract_strided_slice %15 {offsets = [0, 0], sizes = [8, 4], strides = [1, 1]} : vector<8x16xf32> to vector<8x4xf32>
    %17 = vector.extract_strided_slice %15 {offsets = [0, 4], sizes = [8, 4], strides = [1, 1]} : vector<8x16xf32> to vector<8x4xf32>
    %18 = vector.extract_strided_slice %15 {offsets = [0, 8], sizes = [8, 8], strides = [1, 1]} : vector<8x16xf32> to vector<8x8xf32>
    %19 = vector.extract_strided_slice %17 {offsets = [0, 2], sizes = [8, 2], strides = [1, 1]} : vector<8x4xf32> to vector<8x2xf32>
    %20 = vector.extract_strided_slice %17 {offsets = [0, 0], sizes = [8, 2], strides = [1, 1]} : vector<8x4xf32> to vector<8x2xf32>
    %21 = tpu.concatenate %19, %20 in 1 : vector<8x2xf32>, vector<8x2xf32> -> vector<8x4xf32>
    %22 = arith.mulf %16, %17 : vector<8x4xf32>
    %23 = arith.mulf %16, %21 : vector<8x4xf32>
    %24 = vector.extract_strided_slice %22 {offsets = [0, 0], sizes = [8, 1], strides = [1, 1]} : vector<8x4xf32> to vector<8x1xf32>
    %25 = vector.extract_strided_slice %22 {offsets = [0, 1], sizes = [8, 1], strides = [1, 1]} : vector<8x4xf32> to vector<8x1xf32>
    %26 = arith.addf %24, %25 : vector<8x1xf32>
    %cst_11 = arith.constant 0.707106769 : f32
    %27 = vector.broadcast %cst_11 : f32 to vector<8x1xf32>
    %28 = arith.mulf %26, %27 : vector<8x1xf32>
    %29 = vector.extract_strided_slice %22 {offsets = [0, 2], sizes = [8, 1], strides = [1, 1]} : vector<8x4xf32> to vector<8x1xf32>
    %30 = vector.extract_strided_slice %22 {offsets = [0, 3], sizes = [8, 1], strides = [1, 1]} : vector<8x4xf32> to vector<8x1xf32>
    %31 = arith.addf %29, %30 : vector<8x1xf32>
    %cst_12 = arith.constant 0.707106769 : f32
    %32 = vector.broadcast %cst_12 : f32 to vector<8x1xf32>
    %33 = arith.mulf %31, %32 : vector<8x1xf32>
    %34 = vector.extract_strided_slice %23 {offsets = [0, 0], sizes = [8, 1], strides = [1, 1]} : vector<8x4xf32> to vector<8x1xf32>
    %35 = vector.extract_strided_slice %23 {offsets = [0, 1], sizes = [8, 1], strides = [1, 1]} : vector<8x4xf32> to vector<8x1xf32>
    %36 = arith.addf %34, %35 : vector<8x1xf32>
    %cst_13 = arith.constant 0.707106769 : f32
    %37 = vector.broadcast %cst_13 : f32 to vector<8x1xf32>
    %38 = arith.mulf %36, %37 : vector<8x1xf32>
    %39 = vector.extract_strided_slice %23 {offsets = [0, 2], sizes = [8, 1], strides = [1, 1]} : vector<8x4xf32> to vector<8x1xf32>
    %40 = vector.extract_strided_slice %23 {offsets = [0, 3], sizes = [8, 1], strides = [1, 1]} : vector<8x4xf32> to vector<8x1xf32>
    %41 = arith.addf %39, %40 : vector<8x1xf32>
    %cst_14 = arith.constant 0.707106769 : f32
    %42 = vector.broadcast %cst_14 : f32 to vector<8x1xf32>
    %43 = arith.mulf %41, %42 : vector<8x1xf32>
    %44 = arith.maximumf %28, %38 : vector<8x1xf32>
    %45 = arith.subf %28, %44 : vector<8x1xf32>
    %46 = math.exp %45 : vector<8x1xf32>
    %47 = arith.subf %38, %44 : vector<8x1xf32>
    %48 = math.exp %47 : vector<8x1xf32>
    %49 = arith.addf %46, %48 : vector<8x1xf32>
    %50 = tpu.reciprocal %49 {approx = true} : vector<8x1xf32> -> vector<8x1xf32>
    %51 = arith.maximumf %43, %33 : vector<8x1xf32>
    %52 = arith.subf %43, %51 : vector<8x1xf32>
    %53 = math.exp %52 : vector<8x1xf32>
    %54 = arith.subf %33, %51 : vector<8x1xf32>
    %55 = math.exp %54 : vector<8x1xf32>
    %56 = arith.addf %53, %55 : vector<8x1xf32>
    %57 = tpu.reciprocal %56 {approx = true} : vector<8x1xf32> -> vector<8x1xf32>
    %58 = vector.extract_strided_slice %18 {offsets = [0, 0], sizes = [8, 4], strides = [1, 1]} : vector<8x8xf32> to vector<8x4xf32>
    %59 = vector.extract_strided_slice %18 {offsets = [0, 4], sizes = [8, 4], strides = [1, 1]} : vector<8x8xf32> to vector<8x4xf32>
    %60 = arith.mulf %46, %50 : vector<8x1xf32>
    %61 = vector.broadcast %60 : vector<8x1xf32> to vector<8x4xf32>
    %62 = arith.mulf %61, %58 : vector<8x4xf32>
    %63 = arith.mulf %48, %50 : vector<8x1xf32>
    %64 = vector.broadcast %63 : vector<8x1xf32> to vector<8x4xf32>
    %65 = arith.mulf %64, %59 : vector<8x4xf32>
    %66 = arith.addf %62, %65 : vector<8x4xf32>
    %67 = arith.mulf %53, %57 : vector<8x1xf32>
    %68 = vector.broadcast %67 : vector<8x1xf32> to vector<8x4xf32>
    %69 = arith.mulf %68, %58 : vector<8x4xf32>
    %70 = arith.mulf %55, %57 : vector<8x1xf32>
    %71 = vector.broadcast %70 : vector<8x1xf32> to vector<8x4xf32>
    %72 = arith.mulf %71, %59 : vector<8x4xf32>
    %73 = arith.addf %69, %72 : vector<8x4xf32>
    %74 = tpu.concatenate %66, %73 in 1 : vector<8x4xf32>, vector<8x4xf32> -> vector<8x8xf32>
    %cst_15 = arith.constant 5.000000e-01 : f32
    %75 = vector.broadcast %cst_15 : f32 to vector<8x8xf32>
    %76 = arith.mulf %75, %74 : vector<8x8xf32>
    %cst_16 = arith.constant 0.707106769 : f32
    %77 = vector.broadcast %cst_16 : f32 to vector<8x8xf32>
    %78 = arith.mulf %74, %77 : vector<8x8xf32>
    %79 = math.erf %78 : vector<8x8xf32>
    %cst_17 = arith.constant 1.000000e+00 : f32
    %80 = vector.broadcast %cst_17 : f32 to vector<8x8xf32>
    %81 = arith.addf %80, %79 : vector<8x8xf32>
    %82 = arith.mulf %76, %81 : vector<8x8xf32>
    %c0_18 = arith.constant 0 : index
    %c0_19 = arith.constant 0 : index
    %83 = vector.load %arg5[%c0_18, %c0_19] : memref<8x2xf32, #tpu.memory_space<vmem>>, vector<8x2xf32>
    %cst_20 = arith.constant dense<0.000000e+00> : vector<8x2xf32>
    %84 = tpu.matmul %82, %83, %cst_20 {dimension_numbers = #tpu.dot_dimension_numbers<[1], [0], [0], [1], [0, 0, 1, 1], [], []>} : vector<8x8xf32>, vector<8x2xf32>, vector<8x2xf32> -> vector<8x2xf32>
    %c0_21 = arith.constant 0 : index
    %c0_22 = arith.constant 0 : index
    %85 = vector.load %arg6[%c0_21, %c0_22] : memref<1x2xf32, #tpu.memory_space<vmem>>, vector<1x2xf32>
    %86 = vector.broadcast %85 : vector<1x2xf32> to vector<8x2xf32>
    %87 = arith.addf %84, %86 : vector<8x2xf32>
    %88 = vector.extract_strided_slice %87 {offsets = [0, 0], sizes = [8, 1], strides = [1, 1]} : vector<8x2xf32> to vector<8x1xf32>
    %89 = vector.extract_strided_slice %87 {offsets = [0, 1], sizes = [8, 1], strides = [1, 1]} : vector<8x2xf32> to vector<8x1xf32>
    %90 = arith.maximumf %88, %89 : vector<8x1xf32>
    %91 = arith.subf %88, %90 : vector<8x1xf32>
    %92 = math.exp %91 : vector<8x1xf32>
    %93 = arith.subf %89, %90 : vector<8x1xf32>
    %94 = math.exp %93 : vector<8x1xf32>
    %95 = arith.addf %92, %94 : vector<8x1xf32>
    %cst_23 = arith.constant 1.000000e+00 : f32
    %96 = vector.broadcast %cst_23 : f32 to vector<8x1xf32>
    %97 = arith.divf %96, %95 : vector<8x1xf32>
    %98 = arith.mulf %92, %97 : vector<8x1xf32>
    %99 = arith.mulf %94, %97 : vector<8x1xf32>
    %100 = tpu.concatenate %98, %99 in 1 : vector<8x1xf32>, vector<8x1xf32> -> vector<8x2xf32>
    %c0_24 = arith.constant 0 : index
    %c0_25 = arith.constant 0 : index
    %101 = vector.load %arg7[%c0_24, %c0_25] : memref<8x2xf32, #tpu.memory_space<vmem>>, vector<8x2xf32>
    tpu.vector_store %arg7[%c0_24, %c0_25], %100 {strides = array<i32>} : memref<8x2xf32, #tpu.memory_space<vmem>>, vector<8x2xf32>,
    return
  }
  func.func @transform_0(%arg0: i32) -> (i32, i32) {
    %c0_i32 = arith.constant 0 : i32
    %c0_i32_0 = arith.constant 0 : i32
    return %arg0, %c0_i32 : i32, i32
  }
  func.func @transform_1(%arg0: i32) -> (i32, i32) {
    %c0_i32 = arith.constant 0 : i32
    %c0_i32_0 = arith.constant 0 : i32
    %c0_i32_1 = arith.constant 0 : i32
    return %c0_i32, %c0_i32_0 : i32, i32
  }
  func.func @transform_2(%arg0: i32) -> (i32, i32) {
    %c0_i32 = arith.constant 0 : i32
    %c0_i32_0 = arith.constant 0 : i32
    %c0_i32_1 = arith.constant 0 : i32
    return %c0_i32, %c0_i32_0 : i32, i32
  }
  func.func @transform_3(%arg0: i32) -> (i32, i32) {
    %c0_i32 = arith.constant 0 : i32
    %c0_i32_0 = arith.constant 0 : i32
    %c0_i32_1 = arith.constant 0 : i32
    return %c0_i32, %c0_i32_0 : i32, i32
  }
  func.func @transform_4(%arg0: i32) -> (i32, i32) {
    %c0_i32 = arith.constant 0 : i32
    %c0_i32_0 = arith.constant 0 : i32
    %c0_i32_1 = arith.constant 0 : i32
    return %c0_i32, %c0_i32_0 : i32, i32
  }
  func.func @transform_5(%arg0: i32) -> (i32, i32) {
    %c0_i32 = arith.constant 0 : i32
    %c0_i32_0 = arith.constant 0 : i32
    %c0_i32_1 = arith.constant 0 : i32
    return %c0_i32, %c0_i32_0 : i32, i32
  }
  func.func @transform_6(%arg0: i32) -> (i32, i32) {
    %c0_i32 = arith.constant 0 : i32
    %c0_i32_0 = arith.constant 0 : i32
    return %arg0, %c0_i32 : i32, i32
  }
}

</mosaic_0001>

<bundles_post_ra>
// kernel: tpu_custom_call.1
= control target key start
LH: loop header
LB: loop body
LE: loop exit
PB: predicated region body
PF: predicated region fallthrough
CT: control target
= control target key end

     0   :  { %vm43_vm0 = vcmask 1041408   ;;  %vm39_vm1 = vcmask 670720   ;;  %vm121_vm2 = vcmask 1044480   ;;  %vm117_vm7 = vcmask 367616   ;;  %s383_s8 = smov 122   ;;  %s384_s9 = smov 126   ;;  %s501_s1 = inlined_call_operand.vmem [shape: f32[82,45], index: 1, kind: input, shape index: {}]   ;;  %s502_s2 = inlined_call_operand.vmem [shape: f32[1,45], index: 2, kind: input, shape index: {}]   ;;  %s503_s0 = inlined_call_operand.vmem [shape: f32[8,82], index: 0, kind: input, shape index: {}]   ;;  %s504_s3 = inlined_call_operand.vmem [shape: f32[45,16], index: 3, kind: input, shape index: {}]   ;;  %s505_s5 = inlined_call_operand.vmem [shape: f32[1,2], index: 5, kind: input, shape index: {}]   ;;  %s506_s4 = inlined_call_operand.vmem [shape: f32[8,2], index: 4, kind: input, shape index: {}]   ;;  %s507_s6 = inlined_call_operand.vmem [shape: f32[8,2], index: 6, kind: output, shape index: {}]  }
   0x1   :  { %v34_v0 = vld [vmem:[%s501_s1 + $0x50] sm:$0x3]  ;;  %v33_v1 = vld [vmem:[%s501_s1 + $0x48] sm:$0xff]  ;;  %v32_v2 = vld [vmem:[%s501_s1 + $0x40] sm:$0xff]  ;;  %s385_s10 = smov 127   ;;  %vm152_vm8 = vcmask 15360  }
   0x2   :  { %345 = vmatpush.msk.msra.mxu0 %vm43_vm0, %v34_v0  ;;  %v31_v3 = vld [vmem:[%s501_s1 + $0x38] sm:$0xff]  ;;  %v30_v4 = vld [vmem:[%s501_s1 + $0x30] sm:$0xff]  ;;  %v29_v5 = vld [vmem:[%s501_s1 + $0x28] sm:$0xff]  ;;  %s388_s11 = smov 120   ;;  %vm222_vm9 = vcmask 31744   ;;  %vm273_vm14 = vcmask 64512  }
   0x3   :  { %v28_v6 = vld [vmem:[%s501_s1 + $0x20] sm:$0xff]  ;;  %v27_v7 = vld [vmem:[%s501_s1 + $0x18] sm:$0xff]  ;;  %v26_v8 = vld [vmem:[%s501_s1 + $0x10] sm:$0xff]  ;;  %s389_s15 = smov 1  }
   0x4   :  { %53 = vmatpush.msra.mxu0 %v33_v1  ;;  %v25_v9 = vld [vmem:[%s501_s1 + $0x8] sm:$0xff]  ;;  %v24_v10 = vld [vmem:[%s501_s1] sm:$0xff]  ;;  %v114_v26 = vld [vmem:[%s504_s3 + $0x18] sm:$0xff] }
   0x5   :  { %v23_v11 = vld [vmem:[%s503_s0] sm:$0xff]  ;;  %v116_v22 = vld [vmem:[%s504_s3 + $0x28] sm:$0x1f]  ;;  %v113_v29 = vld [vmem:[%s504_s3 + $0x10] sm:$0xff] }
   0x6   :  { %54 = vmatpush.msra.mxu0 %v32_v2  ;;  %v364_v12 = vld [vmem:[%s502_s2] ss:$0 sm:$0xff]  ;;  %348 = vmatpush.msk.msra.mxu1 %vm121_vm2, %v116_v22  ;;  %v112_v31 = vld [vmem:[%s504_s3 + $0x8] sm:$0xff] }
   0x7   :  { %v115_v25 = vld [vmem:[%s504_s3 + $0x20] sm:$0xff] }
   0x8   :  { %55 = vmatpush.msra.mxu0 %v31_v3  ;;  %136 = vmatpush.msra.mxu1 %v115_v25  ;;  %v111_v34 = vld [vmem:[%s504_s3] sm:$0xff]  ;;  %s382_s3 = smov 124   ;;  %v386_v3 = vmov 2  }
   0x9   :  { %361 = vset.pattern.permute.xlu0 %v386_v3 }
   0xa   :  { %56 = vmatpush.msra.mxu0 %v30_v4  ;;  %137 = vmatpush.msra.mxu1 %v114_v26  ;;  %v387_v4 = vmov 0  }
   0xb   :  { %362 = vset.pattern.permute.xlu1 %v387_v4  ;;  %360 = vset.pattern.permute.xlu2 %v387_v4 }
   0xc   :  { %57 = vmatpush.msra.mxu0 %v29_v5  ;;  %138 = vmatpush.msra.mxu1 %v113_v29 }
   0xe   :  { %58 = vmatpush.msra.mxu0 %v28_v6  ;;  %139 = vmatpush.msra.mxu1 %v112_v31 }
  0x10   :  { %59 = vmatpush.msra.mxu0 %v27_v7  ;;  %140 = vmatpush.msra.mxu1 %v111_v34 }
  0x12   :  { %60 = vmatpush.msra.mxu0 %v26_v8 }
  0x14   :  { %61 = vmatpush.msra.mxu0 %v25_v9 }
  0x16   :  { %62 = vmatpush.msra.mxu0 %v24_v10 }
  0x17   :  { %346 = vmatmul.msk.f32.vlgmr.msra.gmra.mxu0 %vm39_vm1, %v23_v11 }
  0x94   :  { %v64_v13 = vpop.f32.mrf.mxu0 }
  0x95   :  { %v65_v14 = vadd.f32 %v364_v12, %v64_v13 }
  0x97   :  { %v68_v15 = vmul.f32 0.70710677, %v65_v14  ;;  %v67_v57 = vmul.f32 0.5, %v65_v14 }
  0x99   :  { %v69_v16 = vmul.f32 %v68_v15, %v68_v15 }
  0x9b   :  { %v70_v17 = vmin.f32 %v69_v16, 16.0 }
  0x9d   :  { %v71_v18 = vmul.f32 2.1237322e-06, %v70_v17  ;;  %v82_v19 = vmul.f32 3.8918573e-05, %v70_v17 }
  0x9f   :  { %v72_v20 = vadd.f32 0.00028619796, %v71_v18  ;;  %v83_v21 = vadd.f32 0.001143296, %v82_v19 }
  0xa1   :  { %v73_v23 = vmul.f32 %v72_v20, %v70_v17  ;;  %v84_v24 = vmul.f32 %v83_v21, %v70_v17 }
  0xa3   :  { %v85_v27 = vadd.f32 0.014752088, %v84_v24  ;;  %v74_v28 = vadd.f32 0.0036580483, %v73_v23 }
  0xa5   :  { %v86_v30 = vmul.f32 %v85_v27, %v70_v17  ;;  %v75_v33 = vmul.f32 %v74_v28, %v70_v17 }
  0xa7   :  { %v87_v32 = vadd.f32 0.112945676, %v86_v30  ;;  %v76_v37 = vadd.f32 0.05243302, %v75_v33 }
  0xa9   :  { %v88_v35 = vmul.f32 %v87_v32, %v70_v17  ;;  %v77_v40 = vmul.f32 %v76_v37, %v70_v17 }
  0xab   :  { %v89_v36 = vadd.f32 0.4994258, %v88_v35  ;;  %v78_v41 = vadd.f32 0.18741608, %v77_v40 }
  0xad   :  { %v90_v38 = vmul.f32 %v89_v36, %v70_v17  ;;  %v79_v43 = vmul.f32 %v78_v41, %v70_v17 }
  0xaf   :  { %v91_v39 = vadd.f32 1.0, %v90_v38  ;;  %v80_v47 = vadd.f32 1.1283791, %v79_v43 }
  0xb1   :  { %366 = vrcp.f32 %v91_v39  ;;  %v103_v46 = vand.u32 2147483648, %v91_v39  ;;  %v101_v49 = vand.u32 2147483647, %v91_v39  ;;  %vm97_vm4 = vweird.f32 %v91_v39 }
  0xb2   :  { %v81_v52 = vmul.f32 %v80_v47, %v68_v15 }
  0xb3   :  { %v104_v51 = vor.u32 1.1754944e-38, %v103_v46  ;;  %vm102_vm6 = vcmp.eq.f32.partialorder %v101_v49, 8.507059e+37  ;;  %v268_v46 = vld [vmem:[%s506_s4] sm:$0xff] }
  0xb4   :  { %292 = vmatpush.msra.mxu2 %v268_v46 }
  0xb7   :  { %v367_v42 = vpop.eup %366 }
  0xb8   :  { %v93_v44 = vmul.f32 %v367_v42, %v91_v39  ;;  %vm98_vm3 = vweird.f32 %v367_v42 }
  0xb9   :  { %vm99_vm5 = vmor %vm97_vm4, %vm98_vm3  ;;  %vm338_vm3 = vcmask 7168  }
  0xba   :  { %v94_v45 = vsub.f32 1.0, %v93_v44 }
  0xbc   :  { %v95_v48 = vmul.f32 %v367_v42, %v94_v45 }
  0xbe   :  { %v96_v50 = vadd.f32 %v367_v42, %v95_v48 }
  0xc0   :  { %v100_v53 = vsel %vm99_vm5, %v367_v42, %v96_v50 }
  0xc1   :  { %v105_v54 = vsel %vm102_vm6, %v104_v51, %v100_v53 }
  0xc2   :  { %v106_v55 = vmul.f32 %v105_v54, %v81_v52 }
  0xc4   :  { %v347_v56 = vclamps-f32 %v106_v55, 1.0 }
  0xc6   :  { %v109_v58 = vadd.f32 1.0, %v347_v56 }
  0xc8   :  { %v110_v59 = vmul.f32 %v109_v58, %v67_v57 }
  0xca   :  { %349 = vmatmul.msk.f32.vlgmr.msra.gmra.mxu1 %vm117_vm7, %v110_v59 }
 0x147   :  { %v142_v60 = vpop.f32.mrf.mxu1 }
 0x148   :  { %154 = vrot.lane.b32.xlu1 %v142_v60, %s382_s3  ;;  %146 = vrot.lane.b32.xlu0 %v142_v60, %s383_s8 }
 0x150   :  { %149 = vrot.lane.b32.xlu0 %v142_v60, %s384_s9 }
 0x1ba   :  { %v155_v61 = vpop.permute.xlu1 %154  ;;  %v147_v62 = vpop.permute.xlu0 %146 }
 0x1bb   :  { %v157_v63 = vmul.f32 %v155_v61, %v142_v60 }
 0x1bd   :  { %160 = vrot.lane.b32.xlu1 %v157_v63, %s385_s10 }
 0x1c2   :  { %v150_v0 = vpop.permute.xlu0 %149 }
 0x1c3   :  { %v153_v1 = vsel %vm152_vm8, %v147_v62, %v150_v0 }
 0x1c4   :  { %v158_v2 = vmul.f32 %v153_v1, %v142_v60 }
 0x1c6   :  { %166 = vrot.lane.b32.xlu2 %v158_v2, %s385_s10 }
 0x220   :  { %v167_v5 = vpop.permute.xlu2 %166 }
 0x221   :  { %v169_v6 = vadd.f32 %v167_v5, %v158_v2 }
 0x223   :  { %v170_v9 = vmul.f32 0.70710677, %v169_v6 }
 0x22f   :  { %v161_v7 = vpop.permute.xlu1 %160 }
 0x230   :  { %v163_v8 = vadd.f32 %v161_v7, %v157_v63 }
 0x232   :  { %v164_v10 = vmul.f32 0.70710677, %v163_v8 }
 0x234   :  { %v171_v11 = vmax.f32 %v164_v10, %v170_v9 }
 0x236   :  { %v172_v12 = vsub.f32 %v164_v10, %v171_v11  ;;  %v175_v13 = vsub.f32 %v170_v9, %v171_v11 }
 0x238   :  { %v173_v14 = vmul.f32 1.442695, %v172_v12  ;;  %v176_v15 = vmul.f32 1.442695, %v175_v13  ;;  %v365_v13 = vld [vmem:[%s505_s5] ss:$0 sm:$0xff] }
 0x23a   :  { %368 = vpow2.f32 %v173_v14 }
 0x23b   :  { %370 = vpow2.f32 %v176_v15 }
 0x240   :  { %v369_v16 = vpop.eup %368 }
 0x241   :  { %v371_v17 = vpop.eup %370 }
 0x242   :  { %v178_v18 = vadd.f32 %v371_v17, %v369_v16 }
 0x244   :  { %372 = vrcp.f32 %v178_v18 }
 0x24a   :  { %v373_v19 = vpop.eup %372 }
 0x24b   :  { %v187_v20 = vmul.f32 %v373_v19, %v371_v17  ;;  %v180_v21 = vmul.f32 %v373_v19, %v369_v16 }
 0x24d   :  { %190 = vperm.xlu2 %360, %v187_v20   ;;  %183 = vperm.xlu1 %362, %v180_v21  }
 0x24e   :  { %205 = vperm.xlu0 %361, %v180_v21  }
 0x255   :  { %363 = vset.pattern.permute.xlu2 %v386_v3 }
 0x256   :  { %200 = vperm.xlu2 %363, %v187_v20  }
 0x2a7   :  { %v191_v22 = vpop.permute.xlu2 %190 }
 0x2a8   :  { %v193_v23 = vmul.f32 %v191_v22, %v142_v60 }
 0x2aa   :  { %195 = vrot.lane.b32.xlu1 %v193_v23, %s382_s3 }
 0x2b0   :  { %v201_v27 = vpop.permute.xlu2 %200 }
 0x2b1   :  { %v203_v29 = vmul.f32 %v201_v27, %v142_v60 }
 0x2bf   :  { %v184_v26 = vpop.permute.xlu1 %183 }
 0x2c0   :  { %v206_v24 = vpop.permute.xlu0 %205  ;;  %v186_v28 = vmul.f32 %v184_v26, %v142_v60 }
 0x2c1   :  { %v208_v25 = vmul.f32 %v206_v24, %v142_v60 }
 0x2c3   :  { %210 = vrot.lane.b32.xlu2 %v208_v25, %s382_s3 }
 0x31c   :  { %v196_v30 = vpop.permute.xlu1 %195 }
 0x31d   :  { %v198_v31 = vadd.f32 %v196_v30, %v186_v28  ;;  %v211_v32 = vpop.permute.xlu2 %210 }
 0x31e   :  { %v213_v33 = vadd.f32 %v211_v32, %v203_v29 }
 0x31f   :  { %215 = vrot.lane.b32.xlu0 %v198_v31, %s388_s11 }
 0x320   :  { %219 = vrot.lane.b32.xlu1 %v213_v33, %s382_s3 }
 0x391   :  { %v216_v34 = vpop.permute.xlu0 %215 }
 0x392   :  { %v220_v35 = vpop.permute.xlu1 %219 }
 0x393   :  { %v223_v36 = vsel %vm222_vm9, %v216_v34, %v220_v35 }
 0x394   :  { %v225_v37 = vmul.f32 0.70710677, %v223_v36  ;;  %v224_v10 = vmul.f32 0.5, %v223_v36 }
 0x396   :  { %v226_v38 = vmul.f32 %v225_v37, %v225_v37 }
 0x398   :  { %v227_v39 = vmin.f32 %v226_v38, 16.0 }
 0x39a   :  { %v228_v40 = vmul.f32 2.1237322e-06, %v227_v39  ;;  %v239_v41 = vmul.f32 3.8918573e-05, %v227_v39 }
 0x39c   :  { %v229_v42 = vadd.f32 0.00028619796, %v228_v40  ;;  %v240_v43 = vadd.f32 0.001143296, %v239_v41 }
 0x39e   :  { %v230_v44 = vmul.f32 %v229_v42, %v227_v39  ;;  %v241_v45 = vmul.f32 %v240_v43, %v227_v39 }
 0x3a0   :  { %v242_v47 = vadd.f32 0.014752088, %v241_v45  ;;  %v231_v48 = vadd.f32 0.0036580483, %v230_v44 }
 0x3a2   :  { %v243_v49 = vmul.f32 %v242_v47, %v227_v39  ;;  %v232_v51 = vmul.f32 %v231_v48, %v227_v39 }
 0x3a4   :  { %v244_v50 = vadd.f32 0.112945676, %v243_v49  ;;  %v233_v54 = vadd.f32 0.05243302, %v232_v51 }
 0x3a6   :  { %v245_v52 = vmul.f32 %v244_v50, %v227_v39  ;;  %v234_v57 = vmul.f32 %v233_v54, %v227_v39 }
 0x3a8   :  { %v246_v53 = vadd.f32 0.4994258, %v245_v52  ;;  %v235_v58 = vadd.f32 0.18741608, %v234_v57 }
 0x3aa   :  { %v247_v55 = vmul.f32 %v246_v53, %v227_v39  ;;  %v236_v60 = vmul.f32 %v235_v58, %v227_v39 }
 0x3ac   :  { %v248_v56 = vadd.f32 1.0, %v247_v55  ;;  %v237_v0 = vadd.f32 1.1283791, %v236_v60 }
 0x3ae   :  { %374 = vrcp.f32 %v248_v56  ;;  %v260_v63 = vand.u32 2147483648, %v248_v56  ;;  %v258_v2 = vand.u32 2147483647, %v248_v56  ;;  %vm254_vm11 = vweird.f32 %v248_v56 }
 0x3af   :  { %v238_v5 = vmul.f32 %v237_v0, %v225_v37 }
 0x3b0   :  { %v261_v4 = vor.u32 1.1754944e-38, %v260_v63  ;;  %vm259_vm13 = vcmp.eq.f32.partialorder %v258_v2, 8.507059e+37 }
 0x3b4   :  { %v375_v59 = vpop.eup %374 }
 0x3b5   :  { %v250_v61 = vmul.f32 %v375_v59, %v248_v56  ;;  %vm255_vm10 = vweird.f32 %v375_v59 }
 0x3b6   :  { %vm256_vm12 = vmor %vm254_vm11, %vm255_vm10 }
 0x3b7   :  { %v251_v62 = vsub.f32 1.0, %v250_v61 }
 0x3b9   :  { %v252_v1 = vmul.f32 %v375_v59, %v251_v62 }
 0x3bb   :  { %v253_v3 = vadd.f32 %v375_v59, %v252_v1 }
 0x3bd   :  { %v257_v6 = vsel %vm256_vm12, %v375_v59, %v253_v3 }
 0x3be   :  { %v262_v7 = vsel %vm259_vm13, %v261_v4, %v257_v6 }
 0x3bf   :  { %v263_v8 = vmul.f32 %v262_v7, %v238_v5 }
 0x3c1   :  { %v350_v9 = vclamps-f32 %v263_v8, 1.0 }
 0x3c3   :  { %v266_v11 = vadd.f32 1.0, %v350_v9 }
 0x3c5   :  { %v267_v12 = vmul.f32 %v266_v11, %v224_v10 }
 0x3c7   :  { %351 = vmatmul.msk.f32.vlgmr.msra.gmra.mxu2 %vm273_vm14, %v267_v12 }
 0x44a   :  { %v294_v14 = vpop.f32.mrf.mxu2 }
 0x44b   :  { %v295_v15 = vadd.f32 %v365_v13, %v294_v14 }
 0x44d   :  { %298 = vrot.lane.b32.xlu2 %v295_v15, %s385_s10 }
 0x4a7   :  { %v299_v16 = vpop.permute.xlu2 %298 }
 0x4a8   :  { %v301_v17 = vmax.f32 %v295_v15, %v299_v16 }
 0x4aa   :  { %306 = vrot.lane.b32.xlu0 %v301_v17, %s389_s15  ;;  %v302_v22 = vsub.f32 %v295_v15, %v301_v17 }
 0x4ac   :  { %v303_v23 = vmul.f32 1.442695, %v302_v22 }
 0x51c   :  { %v307_v18 = vpop.permute.xlu0 %306 }
 0x51d   :  { %v309_v19 = vsub.f32 %v295_v15, %v307_v18 }
 0x51f   :  { %v310_v20 = vmul.f32 1.442695, %v309_v19 }
 0x521   :  { %376 = vpow2.f32 %v310_v20 }
 0x522   :  { %378 = vpow2.f32 %v303_v23 }
 0x527   :  { %v377_v21 = vpop.eup %376 }
 0x528   :  { %313 = vrot.lane.b32.xlu1 %v377_v21, %s385_s10  ;;  %v379_v24 = vpop.eup %378 }
 0x59a   :  { %v314_v25 = vpop.permute.xlu1 %313 }
 0x59b   :  { %v316_v26 = vadd.f32 %v379_v24, %v314_v25 }
 0x59d   :  { %380 = vrcp.f32 %v316_v26  ;;  %v328_v30 = vand.u32 2147483648, %v316_v26  ;;  %v326_v32 = vand.u32 2147483647, %v316_v26  ;;  %vm322_vm0 = vweird.f32 %v316_v26 }
 0x59f   :  { %v329_v34 = vor.u32 1.1754944e-38, %v328_v30  ;;  %vm327_vm2 = vcmp.eq.f32.partialorder %v326_v32, 8.507059e+37 }
 0x5a3   :  { %v381_v27 = vpop.eup %380 }
 0x5a4   :  { %v318_v28 = vmul.f32 %v381_v27, %v316_v26  ;;  %vm323_vm15 = vweird.f32 %v381_v27 }
 0x5a5   :  { %vm324_vm1 = vmor %vm322_vm0, %vm323_vm15 }
 0x5a6   :  { %v319_v29 = vsub.f32 1.0, %v318_v28 }
 0x5a8   :  { %v320_v31 = vmul.f32 %v381_v27, %v319_v29 }
 0x5aa   :  { %v321_v33 = vadd.f32 %v381_v27, %v320_v31 }
 0x5ac   :  { %v325_v35 = vsel %vm324_vm1, %v381_v27, %v321_v33 }
 0x5ad   :  { %v330_v36 = vsel %vm327_vm2, %v329_v34, %v325_v35 }
 0x5ae   :  { %334 = vrot.lane.b32.xlu2 %v330_v36, %s389_s15  ;;  %v332_v37 = vmul.f32 %v379_v24, %v330_v36 }
 0x608   :  { %v335_v38 = vpop.permute.xlu2 %334 }
 0x609   :  { %v337_v39 = vmul.f32 %v377_v21, %v335_v38 }
 0x60b   :  { %v339_v40 = vsel %vm338_vm3, %v332_v37, %v337_v39 }
 0x60c   :  { %340 = vst.msk [vmem:[%s507_s6] sm:$0xff] %vm152_vm8, %v339_v40 }

</bundles_post_ra>
